<compile_context>
chip_gen: v7x
topology: tpu7x:2x2x1
jax: 0.10.0
libtpu: 0.0.40
codegen_flags: <defaults>
</compile_context>

<pallas_src>
import math

import jax
import jax.numpy as jnp
from jax.experimental import pallas as pl
from jax.experimental.pallas import tpu as pltpu

HIDDEN = 1024


# --------------------------------------------------------------------------
# Pallas kernel
# --------------------------------------------------------------------------
def _gamma_network_kernel(scal_ref, t_ref, w_ref, out_ref):
    """Fused gamma_tilde(t), gamma_tilde(0), gamma_tilde(1) + normalization.

    scal_ref : SMEM (8,)   f32 -> [w1, b1, b3, gamma_0, gamma_1, pad, pad, pad]
    t_ref    : VMEM (B, 1) f32 -> timesteps
    w_ref    : VMEM (3, H) f32 -> rows: [w2^T (raw), b2, w3 (raw)]
    out_ref  : VMEM (B, 1) f32 -> gamma(t)
    """
    def softplus(x):
        # numerically stable log(1 + exp(x))
        return jnp.logaddexp(x, jnp.zeros_like(x))

    b1 = scal_ref[1]
    b3 = scal_ref[2]
    g0 = scal_ref[3]
    g1 = scal_ref[4]

    # softplus of the scalar l1 weight, done on a (1,1) vector so the
    # transcendental stays on the vector (VPU/EUP) path.
    w1p = softplus(jnp.full((1, 1), scal_ref[0], jnp.float32))     # (1, 1)

    # Static row slices of the stacked weight slab (single DMA'd input).
    w2p = softplus(w_ref[0:1, :])      # (1, H)  positive l2 weight
    b2 = w_ref[1:2, :]                 # (1, H)  l2 bias
    w3p = softplus(w_ref[2:3, :])      # (1, H)  positive l3 weight

    # ---- gamma_tilde(t) : batch rows ------------------------------------
    t = t_ref[...]                                                  # (B, 1)
    l1_t = t * w1p + b1                                             # (B, 1)
    h_t = jax.nn.sigmoid(l1_t * w2p + b2)                           # (B, H)
    gt_t = l1_t + jnp.sum(h_t * w3p, axis=-1, keepdims=True) + b3   # (B, 1)

    # ---- gamma_tilde(0) : l1(0) = b1 (batch-independent) -----------------
    h_0 = jax.nn.sigmoid(b1 * w2p + b2)                             # (1, H)
    gt_0 = b1 + jnp.sum(h_0 * w3p, axis=-1, keepdims=True) + b3     # (1, 1)

    # ---- gamma_tilde(1) : l1(1) = softplus(w1) + b1 -----------------------
    l1_1 = w1p + b1                                                 # (1, 1)
    h_1 = jax.nn.sigmoid(l1_1 * w2p + b2)                           # (1, H)
    gt_1 = l1_1 + jnp.sum(h_1 * w3p, axis=-1, keepdims=True) + b3   # (1, 1)

    # ---- normalization ----------------------------------------------------
    normalized = (gt_t - gt_0) / (gt_1 - gt_0)
    out_ref[...] = g0 + (g1 - g0) * normalized


# --------------------------------------------------------------------------
# Parameter packing (done ONCE per parameter update, not per forward call)
# --------------------------------------------------------------------------
def pack_params(params):
    """Pack raw params into (scal, w_stack) for the kernel."""
    w1, b1, w2t, b2, w3, b3, g0, g1 = params
    scal = jnp.concatenate([
        w1.reshape(-1), b1.reshape(-1), b3.reshape(-1),
        g0.reshape(-1), g1.reshape(-1),
        jnp.zeros((3,), jnp.float32),
    ]).astype(jnp.float32)                                           # (8,)
    w_stack = jnp.concatenate([w2t, b2, w3], axis=0).astype(jnp.float32)  # (3, H)
    return scal, w_stack


# --------------------------------------------------------------------------
# Wrapper
# --------------------------------------------------------------------------
def gamma_network_forward(t, scal, w_stack):
    """t: (B, 1) float32 -> gamma: (B, 1) float32."""
    B = t.shape[0]
    H = w_stack.shape[1]

    vmem = pl.BlockSpec(memory_space=pltpu.MemorySpace.VMEM)
    smem = pl.BlockSpec(memory_space=pltpu.MemorySpace.SMEM)

    # Advisory: tell XLA this custom call is tiny so it can overlap it.
    cost = pl.CostEstimate(
        flops=6 * (B + 2) * H,
        transcendentals=(B + 2) * H + 3 * H,
        bytes_accessed=(3 * H + 2 * B + 8) * 4,
    )

    return pl.pallas_call(
        _gamma_network_kernel,
        out_shape=jax.ShapeDtypeStruct((B, 1), jnp.float32),
        in_specs=[smem, vmem, vmem],
        out_specs=vmem,
        cost_estimate=cost,
    )(scal, t.astype(jnp.float32), w_stack)


# --------------------------------------------------------------------------
# Deterministic parameter init (mirrors PositiveLinear.reset_parameters shapes)
# --------------------------------------------------------------------------
def init_params(key, hidden=HIDDEN):
    k1, k2, k3, k4, k5, k6 = jax.random.split(key, 6)

    def kaiming_uniform_bound(fan_in):
        # torch kaiming_uniform_ with a=sqrt(5): gain = sqrt(2/(1+5)) = sqrt(1/3)
        gain = math.sqrt(2.0 / 6.0)
        return gain * math.sqrt(3.0 / fan_in)

    offset = -2.0  # weight_init_offset

    # l1: Linear(1 -> 1)
    b = kaiming_uniform_bound(1)
    w1 = jax.random.uniform(k1, (1, 1), jnp.float32, -b, b) + offset
    b1 = jax.random.uniform(k2, (1, 1), jnp.float32, -1.0, 1.0)   # bound = 1/sqrt(1)

    # l2: Linear(1 -> hidden); stored transposed as (1, hidden) for lane layout
    b = kaiming_uniform_bound(1)
    w2t = jax.random.uniform(k3, (1, hidden), jnp.float32, -b, b) + offset
    b2 = jax.random.uniform(k4, (1, hidden), jnp.float32, -1.0, 1.0)

    # l3: Linear(hidden -> 1); weight shape (1, hidden) already lane-friendly
    b = kaiming_uniform_bound(hidden)
    w3 = jax.random.uniform(k5, (1, hidden), jnp.float32, -b, b) + offset
    bb = 1.0 / math.sqrt(hidden)
    b3 = jax.random.uniform(k6, (1, 1), jnp.float32, -bb, bb)

    g0 = jnp.full((1, 1), -5.0, jnp.float32)   # gamma_0
    g1 = jnp.full((1, 1), 10.0, jnp.float32)   # gamma_1
    return (w1, b1, w2t, b2, w3, b3, g0, g1)


# --------------------------------------------------------------------------
# Pure-JAX reference (for correctness check)
# --------------------------------------------------------------------------
def gamma_network_ref(t, params):
    w1, b1, w2t, b2, w3, b3, g0, g1 = params
    sp = lambda x: jnp.logaddexp(x, 0.0)

    def gamma_tilde(x):
        l1 = x * sp(w1[0, 0]) + b1[0, 0]                       # (B, 1)
        h = jax.nn.sigmoid(l1 * sp(w2t) + b2)                  # (B, H)
        l3 = jnp.sum(h * sp(w3), axis=-1, keepdims=True) + b3[0, 0]
        return l1 + l3

    gt_t = gamma_tilde(t)
    gt_0 = gamma_tilde(jnp.zeros_like(t))
    gt_1 = gamma_tilde(jnp.ones_like(t))
    norm = (gt_t - gt_0) / (gt_1 - gt_0)
    return g0[0, 0] + (g1[0, 0] - g0[0, 0]) * norm


# --------------------------------------------------------------------------
if __name__ == "__main__":
    key = jax.random.PRNGKey(0)
    pkey, tkey = jax.random.split(key)

    params = init_params(pkey, hidden=HIDDEN)
    scal, w_stack = pack_params(params)      # packed once, reused every call

    B = 8
    t = jax.random.uniform(tkey, (B, 1), jnp.float32)   # timesteps in [0, 1)

    gamma = gamma_network_forward(t, scal, w_stack)
    gamma = jax.block_until_ready(gamma)

    ref = gamma_network_ref(t, params)
    assert gamma.shape == (B, 1)
    assert jnp.allclose(gamma, ref, rtol=1e-5, atol=1e-5), (gamma, ref)

    # TODO(synk): show_schedule() (constructor-time print of the schedule) is
    # host-side convenience and is intentionally not part of the kernel.
    print("KERNEL_OK")
</pallas_src>

<mosaic_0001>
module attributes {stable_mosaic.version = 11 : i64} {
  func.func @_gamma_network_kernel(%arg0: memref<8xf32, #tpu.memory_space<smem>>, %arg1: memref<8x1xf32, #tpu.memory_space<vmem>>, %arg2: memref<3x1024xf32, #tpu.memory_space<vmem>>, %arg3: memref<8x1xf32, #tpu.memory_space<vmem>>) attributes {dimension_semantics = [], scalar_prefetch = 0 : i64, scratch_operands = 0 : i64, tpu.core_type = #tpu.core_type<tc>} {
    %c1 = arith.constant 1 : index
    %0 = memref.load %arg0[%c1] : memref<8xf32, #tpu.memory_space<smem>>
    %c2 = arith.constant 2 : index
    %1 = memref.load %arg0[%c2] : memref<8xf32, #tpu.memory_space<smem>>
    %c3 = arith.constant 3 : index
    %2 = memref.load %arg0[%c3] : memref<8xf32, #tpu.memory_space<smem>>
    %c4 = arith.constant 4 : index
    %3 = memref.load %arg0[%c4] : memref<8xf32, #tpu.memory_space<smem>>
    %c0 = arith.constant 0 : index
    %4 = memref.load %arg0[%c0] : memref<8xf32, #tpu.memory_space<smem>>
    %5 = vector.broadcast %4 : f32 to vector<1x1xf32>
    %cst = arith.constant 0.000000e+00 : f32
    %6 = vector.broadcast %cst : f32 to vector<1x1xf32>
    %7 = arith.maximumf %5, %6 : vector<1x1xf32>
    %8 = arith.subf %5, %6 : vector<1x1xf32>
    %9 = arith.cmpf one, %8, %8 : vector<1x1xf32>
    %10 = arith.addf %5, %6 : vector<1x1xf32>
    %11 = math.absf %8 : vector<1x1xf32>
    %cst_0 = arith.constant 0.000000e+00 : f32
    %12 = vector.broadcast %cst_0 : f32 to vector<1x1xf32>
    %13 = arith.subf %12, %11 : vector<1x1xf32>
    %14 = math.exp %13 : vector<1x1xf32>
    %15 = math.log1p %14 : vector<1x1xf32>
    %16 = arith.addf %7, %15 : vector<1x1xf32>
    %17 = arith.select %9, %10, %16 : vector<1x1xi1>, vector<1x1xf32>
    %c0_1 = arith.constant 0 : index
    %c0_2 = arith.constant 0 : index
    %18 = vector.load %arg2[%c0_1, %c0_2] : memref<3x1024xf32, #tpu.memory_space<vmem>>, vector<1x1024xf32>
    %cst_3 = arith.constant 0.000000e+00 : f32
    %19 = vector.broadcast %cst_3 : f32 to vector<1x1024xf32>
    %20 = arith.maximumf %18, %19 : vector<1x1024xf32>
    %21 = arith.subf %18, %19 : vector<1x1024xf32>
    %22 = arith.cmpf one, %21, %21 : vector<1x1024xf32>
    %23 = arith.addf %18, %19 : vector<1x1024xf32>
    %24 = math.absf %21 : vector<1x1024xf32>
    %cst_4 = arith.constant 0.000000e+00 : f32
    %25 = vector.broadcast %cst_4 : f32 to vector<1x1024xf32>
    %26 = arith.subf %25, %24 : vector<1x1024xf32>
    %27 = math.exp %26 : vector<1x1024xf32>
    %28 = math.log1p %27 : vector<1x1024xf32>
    %29 = arith.addf %20, %28 : vector<1x1024xf32>
    %30 = arith.select %22, %23, %29 : vector<1x1024xi1>, vector<1x1024xf32>
    %c1_5 = arith.constant 1 : index
    %c0_6 = arith.constant 0 : index
    %31 = vector.load %arg2[%c1_5, %c0_6] : memref<3x1024xf32, #tpu.memory_space<vmem>>, vector<1x1024xf32>
    %c2_7 = arith.constant 2 : index
    %c0_8 = arith.constant 0 : index
    %32 = vector.load %arg2[%c2_7, %c0_8] : memref<3x1024xf32, #tpu.memory_space<vmem>>, vector<1x1024xf32>
    %cst_9 = arith.constant 0.000000e+00 : f32
    %33 = vector.broadcast %cst_9 : f32 to vector<1x1024xf32>
    %34 = arith.maximumf %32, %33 : vector<1x1024xf32>
    %35 = arith.subf %32, %33 : vector<1x1024xf32>
    %36 = arith.cmpf one, %35, %35 : vector<1x1024xf32>
    %37 = arith.addf %32, %33 : vector<1x1024xf32>
    %38 = math.absf %35 : vector<1x1024xf32>
    %cst_10 = arith.constant 0.000000e+00 : f32
    %39 = vector.broadcast %cst_10 : f32 to vector<1x1024xf32>
    %40 = arith.subf %39, %38 : vector<1x1024xf32>
    %41 = math.exp %40 : vector<1x1024xf32>
    %42 = math.log1p %41 : vector<1x1024xf32>
    %43 = arith.addf %34, %42 : vector<1x1024xf32>
    %44 = arith.select %36, %37, %43 : vector<1x1024xi1>, vector<1x1024xf32>
    %c0_11 = arith.constant 0 : index
    %c0_12 = arith.constant 0 : index
    %45 = vector.load %arg1[%c0_11, %c0_12] : memref<8x1xf32, #tpu.memory_space<vmem>>, vector<8x1xf32>
    %46 = vector.broadcast %17 : vector<1x1xf32> to vector<8x1xf32>
    %47 = arith.mulf %45, %46 : vector<8x1xf32>
    %48 = vector.broadcast %0 : f32 to vector<8x1xf32>
    %49 = arith.addf %47, %48 : vector<8x1xf32>
    %50 = vector.broadcast %49 : vector<8x1xf32> to vector<8x1024xf32>
    %51 = vector.broadcast %30 : vector<1x1024xf32> to vector<8x1024xf32>
    %52 = arith.mulf %50, %51 : vector<8x1024xf32>
    %53 = vector.broadcast %31 : vector<1x1024xf32> to vector<8x1024xf32>
    %54 = arith.addf %52, %53 : vector<8x1024xf32>
    %55 = arith.negf %54 : vector<8x1024xf32>
    %56 = math.exp %55 : vector<8x1024xf32>
    %cst_13 = arith.constant 1.000000e+00 : f32
    %57 = vector.broadcast %cst_13 : f32 to vector<8x1024xf32>
    %58 = arith.addf %57, %56 : vector<8x1024xf32>
    %59 = arith.divf %57, %58 : vector<8x1024xf32>
    %60 = vector.broadcast %44 : vector<1x1024xf32> to vector<8x1024xf32>
    %61 = arith.mulf %59, %60 : vector<8x1024xf32>
    %cst_14 = arith.constant dense<0.000000e+00> : vector<8xf32>
    %62 = vector.multi_reduction <add>, %61, %cst_14 [1] : vector<8x1024xf32> to vector<8xf32>
    %63 = vector.shape_cast %62 : vector<8xf32> to vector<8x1xf32>
    %64 = arith.addf %49, %63 : vector<8x1xf32>
    %65 = vector.broadcast %1 : f32 to vector<8x1xf32>
    %66 = arith.addf %64, %65 : vector<8x1xf32>
    %67 = vector.broadcast %0 : f32 to vector<1x1024xf32>
    %68 = arith.mulf %67, %30 : vector<1x1024xf32>
    %69 = arith.addf %68, %31 : vector<1x1024xf32>
    %70 = arith.negf %69 : vector<1x1024xf32>
    %71 = math.exp %70 : vector<1x1024xf32>
    %cst_15 = arith.constant 1.000000e+00 : f32
    %72 = vector.broadcast %cst_15 : f32 to vector<1x1024xf32>
    %73 = arith.addf %72, %71 : vector<1x1024xf32>
    %74 = arith.divf %72, %73 : vector<1x1024xf32>
    %75 = arith.mulf %74, %44 : vector<1x1024xf32>
    %cst_16 = arith.constant dense<0.000000e+00> : vector<1xf32>
    %76 = vector.multi_reduction <add>, %75, %cst_16 [1] : vector<1x1024xf32> to vector<1xf32>
    %77 = vector.shape_cast %76 : vector<1xf32> to vector<1x1xf32>
    %78 = vector.broadcast %0 : f32 to vector<1x1xf32>
    %79 = arith.addf %78, %77 : vector<1x1xf32>
    %80 = vector.broadcast %1 : f32 to vector<1x1xf32>
    %81 = arith.addf %79, %80 : vector<1x1xf32>
    %82 = vector.broadcast %0 : f32 to vector<1x1xf32>
    %83 = arith.addf %17, %82 : vector<1x1xf32>
    %84 = vector.broadcast %83 : vector<1x1xf32> to vector<1x1024xf32>
    %85 = arith.mulf %84, %30 : vector<1x1024xf32>
    %86 = arith.addf %85, %31 : vector<1x1024xf32>
    %87 = arith.negf %86 : vector<1x1024xf32>
    %88 = math.exp %87 : vector<1x1024xf32>
    %cst_17 = arith.constant 1.000000e+00 : f32
    %89 = vector.broadcast %cst_17 : f32 to vector<1x1024xf32>
    %90 = arith.addf %89, %88 : vector<1x1024xf32>
    %91 = arith.divf %89, %90 : vector<1x1024xf32>
    %92 = arith.mulf %91, %44 : vector<1x1024xf32>
    %cst_18 = arith.constant dense<0.000000e+00> : vector<1xf32>
    %93 = vector.multi_reduction <add>, %92, %cst_18 [1] : vector<1x1024xf32> to vector<1xf32>
    %94 = vector.shape_cast %93 : vector<1xf32> to vector<1x1xf32>
    %95 = arith.addf %83, %94 : vector<1x1xf32>
    %96 = vector.broadcast %1 : f32 to vector<1x1xf32>
    %97 = arith.addf %95, %96 : vector<1x1xf32>
    %98 = vector.broadcast %81 : vector<1x1xf32> to vector<8x1xf32>
    %99 = arith.subf %66, %98 : vector<8x1xf32>
    %100 = arith.subf %97, %81 : vector<1x1xf32>
    %101 = vector.broadcast %100 : vector<1x1xf32> to vector<8x1xf32>
    %102 = arith.divf %99, %101 : vector<8x1xf32>
    %103 = arith.subf %3, %2 : f32
    %104 = vector.broadcast %103 : f32 to vector<8x1xf32>
    %105 = arith.mulf %104, %102 : vector<8x1xf32>
    %106 = vector.broadcast %2 : f32 to vector<8x1xf32>
    %107 = arith.addf %106, %105 : vector<8x1xf32>
    %c0_19 = arith.constant 0 : index
    %c0_20 = arith.constant 0 : index
    %108 = vector.load %arg3[%c0_19, %c0_20] : memref<8x1xf32, #tpu.memory_space<vmem>>, vector<8x1xf32>
    tpu.vector_store %arg3[%c0_19, %c0_20], %107 {strides = array<i32>} : memref<8x1xf32, #tpu.memory_space<vmem>>, vector<8x1xf32>,
    return
  }
}

</mosaic_0001>

<bundles_post_ra>
// kernel: tpu_custom_call.1
= control target key start
LH: loop header
LB: loop body
LE: loop exit
PB: predicated region body
PF: predicated region fallthrough
CT: control target
= control target key end

     0   :  { %8 = vsyncpa [#allocation4], 0  ;;  %s797_s0 = inlined_call_operand.vmem [shape: f32[8], index: 0, kind: input, shape index: {}]   ;;  %s798_s1 = inlined_call_operand.vmem [shape: f32[8,1], index: 1, kind: input, shape index: {}]   ;;  %s799_s2 = inlined_call_operand.hbm [shape: f32[3,1024], index: 2, kind: input, shape index: {}]   ;;  %s800_s3 = inlined_call_operand.vmem [shape: f32[8,1], index: 3, kind: output, shape index: {}]  }
   0x1   :  { %s16_s14 = sshll.u32 %s797_s0, 4  ;;  %s17_s14 = int_to_ptr.vmem [resolvable:$true] %s16_s14 }
   0x2   :  { %9 = vsyncpa [#allocation3], 0  ;;  %s557_s15 = scalar_lea.vmem %s17_s14, 16  ;;  %p562_p1 = scmp.lt.s32.totalorder %s17_s14, %s17_s14 }
   0x3   :  { %p558_p0 = scmp.ne.s32.totalorder %s17_s14, %s557_s15  ;;  %p563_p2 = scmp.lt.s32.totalorder %s557_s15, %s557_s15 }
   0x5   :  { %p564_p3 = por %p563_p2, %p562_p1 }
   0x7   :  { %p565_p4 = pnand %p564_p3, %p558_p0 }
   0x9   :  { %568 = shalt.err (!%p565_p4)
}
   0xa   :  { %s595_s16 = smov [#allocation2]   ;;  %s596_s17 = smov [#allocation5]  }
   0xb   :  { %19 = dma.vmem_to_smem %s17_s14, 16, %s595_s16, [#allocation4]  }
   0xc   :  { %s28_s18 = sshll.u32 %s596_s17, 4  ;;  %s569_s21 = scalar_lea.hbm %s799_s2, 512  ;;  %s29_s18 = int_to_ptr.vmem [resolvable:$true] %s28_s18 }
   0xd   :  { %p570_p5 = scmp.ne.s32.totalorder %s799_s2, %s569_s21  ;;  %p573_p6 = scmp.lt.u32.totalorder %s569_s21, %s799_s2 }
   0xf   :  { %p575_p7 = pnand %p573_p6, %p570_p5 }
  0x11   :  { %578 = shalt.err (!%p575_p7)
}
  0x12   :  { %s579_s25 = scalar_lea.vmem %s29_s18, 512  ;;  %p584_p9 = scmp.lt.s32.totalorder %s29_s18, %s29_s18 }
  0x13   :  { %p580_p8 = scmp.ne.s32.totalorder %s29_s18, %s579_s25  ;;  %p585_p10 = scmp.lt.s32.totalorder %s579_s25, %s579_s25 }
  0x15   :  { %p586_p11 = por %p585_p10, %p584_p9 }
  0x17   :  { %p587_p12 = pnand %p586_p11, %p580_p8 }
  0x19   :  { %590 = shalt.err (!%p587_p12)
}
  0x1a   :  { %31 = dma.hbm_to_vmem [thread:$0]  %s799_s2, 512, %s29_s18, [#allocation3]  }
  0x1b   :  { %591 = dma.done.wait [#allocation4], 16  }
  0x1c   :  { %592 = vsyncadd [#allocation4], 4294967280 }
  0x1d   :  { %593 = dma.done.wait [#allocation3], 512  }
  0x1e   :  { %594 = vsyncadd [#allocation3], 4294966784 }
  0x1f   :  { %38 = sfence }
  0x20   :  { %s43_s28 = sld [smem:[#allocation2]]  ;;  %v597_v0 = vmov 0   ;;  %v63_v1 = vld [vmem:[#allocation5] ss:$4 sm:$0xff]  ;;  %v633_v8 = vld [vmem:[#allocation5 + $0x2] ss:$4 sm:$0xff]  ;;  %v114_v40 = vlaneseq }
  0x21   :  { %502 = vset.pattern.permute.xlu0 %v597_v0  ;;  %v67_v2 = vand.u32 2147483647, %v63_v1  ;;  %v89_v10 = vand.u32 2147483647, %v633_v8  ;;  %s485_s2 = sld [smem:[#allocation2 + $0x1]]  ;;  %v64_v24 = vmax.f32 %v63_v1, 0.0  ;;  %vm65_vm1 = vcmp.ne.f32.partialorder %v63_v1, %v63_v1 }
  0x22   :  { %v638_v35 = vld [vmem:[#allocation5 + $0x1] ss:$4 sm:$0xff]  ;;  %v115_v48 = vshrl.u32 %v114_v40, 7  ;;  %vm87_vm5 = vcmp.ne.f32.partialorder %v633_v8, %v633_v8  ;;  %vm370_vm6 = vcmask 1040384   ;;  %s487_s4 = sld [smem:[#allocation2 + $0x3]]  ;;  %s488_s5 = sld [smem:[#allocation2 + $0x4]] }
  0x23   :  { %v68_v3 = vsub.f32 0.0, %v67_v2  ;;  %v90_v11 = vsub.f32 0.0, %v89_v10  ;;  %v104_v42 = vld [vmem:[%s798_s1] sm:$0xff]  ;;  %s486_s1 = sld [smem:[#allocation2 + $0x2]]  ;;  %vm477_vm7 = vcmask 7168  }
  0x24   :  { %v658_v53 = vsub.s32 5, %v115_v48  ;;  %v660_v54 = vsub.s32 6, %v115_v48  ;;  %v662_v55 = vsub.s32 7, %v115_v48 }
  0x25   :  { %v69_v5 = vmul.f32 1.442695, %v68_v3  ;;  %v91_v14 = vmul.f32 1.442695, %v90_v11 }
  0x26   :  { %v44_v4 = vstv %s43_s28  ;;  %v186_v63 = vrot.slane %v638_v35, %v658_v53  ;;  %v190_v0 = vrot.slane %v638_v35, %v660_v54 }
  0x27   :  { %v48_v6 = vand.u32 2147483647, %v44_v4  ;;  %503 = vpow2.f32 %v69_v5  ;;  %v45_v32 = vmax.f32 %v44_v4, 0.0  ;;  %v640_v37 = vstv %s485_s2 }
  0x28   :  { %vm46_vm3 = vcmp.ne.f32.partialorder %v44_v4, %v44_v4  ;;  %s472_s6 = ssub.f32 %s488_s5, %s487_s4 }
  0x29   :  { %v49_v7 = vsub.f32 0.0, %v48_v6  ;;  %v86_v6 = vmax.f32 %v633_v8, 0.0 }
  0x2b   :  { %v50_v9 = vmul.f32 1.442695, %v49_v7 }
  0x2d   :  { %505 = vpow2.f32 %v50_v9 }
  0x31   :  { %v504_v12 = vpop.eup %503 }
  0x32   :  { %v71_v13 = vadd.f32 1.0, %v504_v12  ;;  %v74_v15 = vmul.f32 -0.5, %v504_v12  ;;  %v77_v20 = vand.u32 2147483647, %v504_v12 }
  0x34   :  { %507 = vlog2.f32 %v71_v13  ;;  %v75_v18 = vadd.f32 1.0, %v74_v15  ;;  %vm78_vm0 = vcmp.lt.f32.partialorder %v77_v20, 0.0004427343  ;;  %v683_v15 = vsub.s32 0, %v115_v48 }
  0x35   :  { %509 = vpow2.f32 %v91_v14 }
  0x36   :  { %v76_v21 = vmul.f32 %v504_v12, %v75_v18 }
  0x37   :  { %v506_v16 = vpop.eup %505 }
  0x38   :  { %v52_v17 = vadd.f32 1.0, %v506_v16  ;;  %v55_v19 = vmul.f32 -0.5, %v506_v16  ;;  %v58_v25 = vand.u32 2147483647, %v506_v16 }
  0x3a   :  { %511 = vlog2.f32 %v52_v17  ;;  %v56_v23 = vadd.f32 1.0, %v55_v19  ;;  %vm59_vm2 = vcmp.lt.f32.partialorder %v58_v25, 0.0004427343  ;;  %v687_v17 = vsub.s32 2, %v115_v48 }
  0x3c   :  { %v57_v29 = vmul.f32 %v506_v16, %v56_v23  ;;  %v685_v16 = vsub.s32 1, %v115_v48  ;;  %v696_v23 = vsub.s32 4, %v115_v48 }
  0x3e   :  { %v508_v22 = vpop.eup %507 }
  0x3f   :  { %v73_v26 = vmul.f32 0.6931472, %v508_v22  ;;  %v510_v27 = vpop.eup %509 }
  0x40   :  { %v93_v36 = vadd.f32 1.0, %v510_v27  ;;  %v96_v51 = vmul.f32 -0.5, %v510_v27  ;;  %v99_v61 = vand.u32 2147483647, %v510_v27 }
  0x41   :  { %v79_v28 = vsel %vm78_vm0, %v76_v21, %v73_v26  ;;  %v692_v21 = vsub.s32 3, %v115_v48 }
  0x42   :  { %v80_v30 = vadd.f32 %v79_v28, %v64_v24  ;;  %513 = vlog2.f32 %v93_v36  ;;  %v97_v60 = vadd.f32 1.0, %v96_v51  ;;  %vm100_vm4 = vcmp.lt.f32.partialorder %v99_v61, 0.0004427343 }
  0x44   :  { %v512_v31 = vpop.eup %511  ;;  %v636_v34 = vsel %vm65_vm1, %v63_v1, %v80_v30  ;;  %v194_v1 = vrot.slane %v638_v35, %v662_v55 }
  0x45   :  { %v54_v33 = vmul.f32 0.6931472, %v512_v31  ;;  %v320_v38 = vmul.f32 %v640_v37, %v636_v34  ;;  %v137_v57 = vrot.slane %v636_v34, %v658_v53  ;;  %v141_v58 = vrot.slane %v636_v34, %v660_v54 }
  0x46   :  { %v145_v59 = vrot.slane %v636_v34, %v662_v55 }
  0x47   :  { %v60_v39 = vsel %vm59_vm2, %v57_v29, %v54_v33  ;;  %v321_v43 = vadd.f32 %v320_v38, %v638_v35 }
  0x48   :  { %v61_v41 = vadd.f32 %v60_v39, %v45_v32 }
  0x49   :  { %v497_v45 = vmul.f32 -1.442695, %v321_v43 }
  0x4a   :  { %v62_v44 = vsel %vm46_vm3, %v44_v4, %v61_v41  ;;  %v98_v4 = vmul.f32 %v510_v27, %v97_v60 }
  0x4b   :  { %v105_v46 = vmul.f32 %v104_v42, %v62_v44  ;;  %v649_v47 = vadd.f32 %v640_v37, %v62_v44  ;;  %515 = vpow2.f32 %v497_v45 }
  0x4c   :  { %v514_v62 = vpop.eup %513 }
  0x4d   :  { %v652_v49 = vadd.f32 %v640_v37, %v105_v46  ;;  %v391_v50 = vmul.f32 %v649_v47, %v636_v34  ;;  %v95_v3 = vmul.f32 0.6931472, %v514_v62 }
  0x4f   :  { %v392_v52 = vadd.f32 %v391_v50, %v638_v35  ;;  %110 = vperm.xlu0 %502, %v652_v49   ;;  %v101_v7 = vsel %vm100_vm4, %v98_v4, %v95_v3 }
  0x50   :  { %v102_v10 = vadd.f32 %v101_v7, %v86_v6 }
  0x51   :  { %v498_v56 = vmul.f32 -1.442695, %v392_v52 }
  0x52   :  { %v680_v12 = vsel %vm87_vm5, %v633_v8, %v102_v10 }
  0x53   :  { %517 = vpow2.f32 %v498_v56  ;;  %v283_v31 = vrot.slane %v680_v12, %v658_v53  ;;  %v287_v32 = vrot.slane %v680_v12, %v660_v54  ;;  %v291_v33 = vrot.slane %v680_v12, %v662_v55 }
  0x55   :  { %v516_v2 = vpop.eup %515 }
  0x56   :  { %v325_v5 = vadd.f32 1.0, %v516_v2 }
  0x58   :  { %519 = vrcp.f32 %v325_v5 }
  0x5d   :  { %v518_v9 = vpop.eup %517 }
  0x5e   :  { %v396_v11 = vadd.f32 1.0, %v518_v9 }
  0x60   :  { %521 = vrcp.f32 %v396_v11 }
  0x62   :  { %v520_v13 = vpop.eup %519 }
  0x63   :  { %v328_v14 = vmul.f32 %v520_v13, %v680_v12 }
  0x65   :  { %v333_v18 = vrot.slane %v328_v14, %v683_v15  ;;  %v337_v19 = vrot.slane %v328_v14, %v685_v16  ;;  %v341_v20 = vrot.slane %v328_v14, %v687_v17  ;;  %v345_v27 = vrot.slane %v328_v14, %v692_v21 }
  0x66   :  { %v349_v29 = vrot.slane %v328_v14, %v696_v23  ;;  %v353_v41 = vrot.slane %v328_v14, %v658_v53  ;;  %v357_v50 = vrot.slane %v328_v14, %v660_v54  ;;  %v361_v62 = vrot.slane %v328_v14, %v662_v55 }
  0x67   :  { %v371_v8 = vsel %vm370_vm6, %v333_v18, 0.0  ;;  %v372_v22 = vsel %vm370_vm6, %v337_v19, 0.0  ;;  %v374_v25 = vsel %vm370_vm6, %v341_v20, 0.0  ;;  %v376_v42 = vsel %vm370_vm6, %v345_v27, 0.0 }
  0x68   :  { %v373_v24 = vadd.f32 %v372_v22, %v371_v8  ;;  %v378_v51 = vsel %vm370_vm6, %v349_v29, 0.0  ;;  %v380_v2 = vsel %vm370_vm6, %v353_v41, 0.0  ;;  %v382_v7 = vsel %vm370_vm6, %v357_v50, 0.0 }
  0x69   :  { %v384_v18 = vsel %vm370_vm6, %v361_v62, 0.0  ;;  %v121_v27 = vrot.slane %v636_v34, %v685_v16  ;;  %v129_v29 = vrot.slane %v636_v34, %v692_v21  ;;  %v182_v41 = vrot.slane %v638_v35, %v696_v23 }
  0x6a   :  { %v522_v26 = vpop.eup %521  ;;  %v375_v30 = vadd.f32 %v374_v25, %v373_v24 }
  0x6b   :  { %v399_v28 = vmul.f32 %v522_v26, %v680_v12  ;;  %v117_v26 = vrot.slane %v636_v34, %v683_v15 }
  0x6c   :  { %v377_v60 = vadd.f32 %v376_v42, %v375_v30  ;;  %v133_v30 = vrot.slane %v636_v34, %v696_v23 }
  0x6d   :  { %v404_v36 = vrot.slane %v399_v28, %v683_v15  ;;  %v408_v38 = vrot.slane %v399_v28, %v685_v16  ;;  %v412_v39 = vrot.slane %v399_v28, %v687_v17  ;;  %v416_v40 = vrot.slane %v399_v28, %v692_v21 }
  0x6e   :  { %v420_v43 = vrot.slane %v399_v28, %v696_v23  ;;  %v424_v52 = vrot.slane %v399_v28, %v658_v53  ;;  %v428_v3 = vrot.slane %v399_v28, %v660_v54  ;;  %v379_v5 = vadd.f32 %v378_v51, %v377_v60 }
  0x6f   :  { %v441_v44 = vsel %vm370_vm6, %v404_v36, 0.0  ;;  %v442_v45 = vsel %vm370_vm6, %v408_v38, 0.0  ;;  %v444_v46 = vsel %vm370_vm6, %v412_v39, 0.0  ;;  %v446_v56 = vsel %vm370_vm6, %v416_v40, 0.0 }
  0x70   :  { %v443_v48 = vadd.f32 %v442_v45, %v441_v44  ;;  %v448_v4 = vsel %vm370_vm6, %v420_v43, 0.0  ;;  %v432_v9 = vrot.slane %v399_v28, %v662_v55  ;;  %v450_v10 = vsel %vm370_vm6, %v424_v52, 0.0 }
  0x71   :  { %v381_v11 = vadd.f32 %v380_v2, %v379_v5  ;;  %v452_v14 = vsel %vm370_vm6, %v428_v3, 0.0  ;;  %v125_v28 = vrot.slane %v636_v34, %v687_v17  ;;  %v166_v36 = vrot.slane %v638_v35, %v683_v15 }
  0x72   :  { %v445_v61 = vadd.f32 %v444_v46, %v443_v48  ;;  %v454_v8 = vsel %vm370_vm6, %v432_v9, 0.0  ;;  %v170_v38 = vrot.slane %v638_v35, %v685_v16  ;;  %v174_v39 = vrot.slane %v638_v35, %v687_v17 }
  0x73   :  { %v383_v19 = vadd.f32 %v382_v7, %v381_v11  ;;  %v178_v40 = vrot.slane %v638_v35, %v692_v21 }
  0x74   :  { %v447_v6 = vadd.f32 %v446_v56, %v445_v61 }
  0x75   :  { %v385_v22 = vadd.f32 %v384_v18, %v383_v19 }
  0x76   :  { %v449_v13 = vadd.f32 %v448_v4, %v447_v6 }
  0x77   :  { %386 = vadd.xlane.f32.xlu0 %v385_v22 }
  0x78   :  { %v451_v20 = vadd.f32 %v450_v10, %v449_v13 }
  0x7a   :  { %v453_v24 = vadd.f32 %v452_v14, %v451_v20 }
  0x7c   :  { %v455_v25 = vadd.f32 %v454_v8, %v453_v24 }
  0x7e   :  { %456 = vadd.xlane.f32.xlu1 %v455_v25 }
  0xce   :  { %v111_v42 = vpop.permute.xlu0 %110 }
  0xcf   :  { %v154_v43 = vmul.f32 %v117_v26, %v111_v42  ;;  %v155_v44 = vmul.f32 %v121_v27, %v111_v42  ;;  %v156_v45 = vmul.f32 %v125_v28, %v111_v42  ;;  %v157_v46 = vmul.f32 %v129_v29, %v111_v42 }
  0xd0   :  { %v158_v48 = vmul.f32 %v133_v30, %v111_v42  ;;  %v159_v50 = vmul.f32 %v137_v57, %v111_v42  ;;  %v160_v51 = vmul.f32 %v141_v58, %v111_v42  ;;  %v161_v52 = vmul.f32 %v145_v59, %v111_v42 }
  0xd1   :  { %v203_v56 = vadd.f32 %v166_v36, %v154_v43  ;;  %v204_v60 = vadd.f32 %v170_v38, %v155_v44  ;;  %v205_v61 = vadd.f32 %v174_v39, %v156_v45  ;;  %v206_v62 = vadd.f32 %v178_v40, %v157_v46 }
  0xd2   :  { %v207_v2 = vadd.f32 %v182_v41, %v158_v48  ;;  %v208_v3 = vadd.f32 %v186_v63, %v159_v50  ;;  %v209_v57 = vadd.f32 %v190_v0, %v160_v51  ;;  %v210_v58 = vadd.f32 %v194_v1, %v161_v52 }
  0xd3   :  { %v489_v4 = vmul.f32 -1.442695, %v203_v56  ;;  %v490_v34 = vmul.f32 -1.442695, %v204_v60  ;;  %v491_v59 = vmul.f32 -1.442695, %v205_v61  ;;  %v263_v28 = vrot.slane %v680_v12, %v683_v15 }
  0xd4   :  { %v492_v5 = vmul.f32 -1.442695, %v206_v62  ;;  %v493_v6 = vmul.f32 -1.442695, %v207_v2  ;;  %v494_v7 = vmul.f32 -1.442695, %v208_v3  ;;  %v267_v29 = vrot.slane %v680_v12, %v685_v16 }
  0xd5   :  { %523 = vpow2.f32 %v489_v4  ;;  %v495_v9 = vmul.f32 -1.442695, %v209_v57  ;;  %v496_v63 = vmul.f32 -1.442695, %v210_v58  ;;  %v271_v30 = vrot.slane %v680_v12, %v687_v17 }
  0xd6   :  { %525 = vpow2.f32 %v490_v34  ;;  %v275_v38 = vrot.slane %v680_v12, %v692_v21  ;;  %v279_v40 = vrot.slane %v680_v12, %v696_v23  ;;  %v318_v34 = vstv %s486_s1 }
  0xd7   :  { %527 = vpow2.f32 %v491_v59 }
  0xd8   :  { %529 = vpow2.f32 %v492_v5 }
  0xd9   :  { %531 = vpow2.f32 %v493_v6 }
  0xda   :  { %533 = vpow2.f32 %v494_v7 }
  0xdb   :  { %535 = vpow2.f32 %v495_v9  ;;  %v473_v9 = vstv %s472_s6 }
  0xdc   :  { %537 = vpow2.f32 %v496_v63  ;;  %v475_v63 = vstv %s487_s4 }
  0xdf   :  { %v524_v0 = vpop.eup %523 }
  0xe0   :  { %v526_v10 = vpop.eup %525  ;;  %v235_v35 = vadd.f32 1.0, %v524_v0 }
  0xe1   :  { %v528_v1 = vpop.eup %527  ;;  %v236_v11 = vadd.f32 1.0, %v526_v10 }
  0xe2   :  { %v530_v13 = vpop.eup %529  ;;  %539 = vrcp.f32 %v235_v35  ;;  %v237_v18 = vadd.f32 1.0, %v528_v1 }
  0xe3   :  { %v532_v14 = vpop.eup %531  ;;  %541 = vrcp.f32 %v236_v11  ;;  %v238_v19 = vadd.f32 1.0, %v530_v13 }
  0xe4   :  { %v534_v20 = vpop.eup %533  ;;  %v239_v8 = vadd.f32 1.0, %v532_v14  ;;  %543 = vrcp.f32 %v237_v18 }
  0xe5   :  { %v536_v22 = vpop.eup %535  ;;  %v240_v24 = vadd.f32 1.0, %v534_v20  ;;  %545 = vrcp.f32 %v238_v19 }
  0xe6   :  { %v538_v25 = vpop.eup %537  ;;  %v241_v26 = vadd.f32 1.0, %v536_v22  ;;  %547 = vrcp.f32 %v239_v8 }
  0xe7   :  { %v242_v27 = vadd.f32 1.0, %v538_v25  ;;  %549 = vrcp.f32 %v240_v24 }
  0xe8   :  { %551 = vrcp.f32 %v241_v26 }
  0xe9   :  { %553 = vrcp.f32 %v242_v27 }
  0xec   :  { %v540_v36 = vpop.eup %539 }
  0xed   :  { %v542_v39 = vpop.eup %541  ;;  %v300_v41 = vmul.f32 %v540_v36, %v263_v28 }
  0xee   :  { %v544_v42 = vpop.eup %543  ;;  %v301_v43 = vmul.f32 %v542_v39, %v267_v29 }
  0xef   :  { %v546_v44 = vpop.eup %545  ;;  %v302_v45 = vmul.f32 %v544_v42, %v271_v30 }
  0xf0   :  { %v548_v46 = vpop.eup %547  ;;  %v303_v48 = vmul.f32 %v546_v44, %v275_v38  ;;  %v308_v50 = vadd.f32 %v301_v43, %v300_v41 }
  0xf1   :  { %v550_v16 = vpop.eup %549  ;;  %v304_v51 = vmul.f32 %v548_v46, %v279_v40 }
  0xf2   :  { %v552_v52 = vpop.eup %551  ;;  %v305_v17 = vmul.f32 %v550_v16, %v283_v31  ;;  %v309_v21 = vadd.f32 %v308_v50, %v302_v45 }
  0xf3   :  { %v554_v56 = vpop.eup %553  ;;  %v306_v23 = vmul.f32 %v552_v52, %v287_v32 }
  0xf4   :  { %v307_v60 = vmul.f32 %v554_v56, %v291_v33  ;;  %v310_v61 = vadd.f32 %v309_v21, %v303_v48 }
  0xf6   :  { %v311_v62 = vadd.f32 %v310_v61, %v304_v51 }
  0xf8   :  { %v312_v2 = vadd.f32 %v311_v62, %v305_v17 }
  0xfa   :  { %v313_v3 = vadd.f32 %v312_v2, %v306_v23 }
  0xfc   :  { %v314_v57 = vadd.f32 %v313_v3, %v307_v60 }
  0xfe   :  { %315 = vadd.xlane.f32.xlu1 %v314_v57 }
 0x104   :  { %v387_v53 = vpop.xlane.xlu0 %386 }
 0x105   :  { %v388_v4 = vadd.f32 %v387_v53, %v640_v37 }
 0x107   :  { %v389_v32 = vadd.f32 %v388_v4, %v318_v34 }
 0x109   :  { %v463_v5 = vrot.slane %v389_v32, %v683_v15 }
 0x10b   :  { %v457_v58 = vpop.xlane.xlu1 %456 }
 0x10c   :  { %v458_v31 = vadd.f32 %v457_v58, %v649_v47 }
 0x10e   :  { %v459_v54 = vadd.f32 %v458_v31, %v318_v34 }
 0x110   :  { %v465_v59 = vsub.f32 %v459_v54, %v389_v32 }
 0x112   :  { %v469_v55 = vrot.slane %v465_v59, %v683_v15 }
 0x114   :  { %555 = vrcp.f32 %v469_v55 }
 0x11e   :  { %v556_v7 = vpop.eup %555 }
 0x18b   :  { %v316_v12 = vpop.xlane.xlu1 %315 }
 0x18c   :  { %v317_v33 = vadd.f32 %v316_v12, %v652_v49 }
 0x18e   :  { %v319_v6 = vadd.f32 %v318_v34, %v317_v33 }
 0x190   :  { %v464_v47 = vsub.f32 %v319_v6, %v463_v5 }
 0x192   :  { %v471_v37 = vmul.f32 %v556_v7, %v464_v47 }
 0x194   :  { %v474_v0 = vmul.f32 %v473_v9, %v471_v37 }
 0x196   :  { %v476_v10 = vadd.f32 %v475_v63, %v474_v0 }
 0x198   :  { %478 = vst.msk [vmem:[%s800_s3] sm:$0xff] %vm477_vm7, %v476_v10 }
 0x199   :  { %483 = vsyncpa [#allocation3], 1 }
 0x19a   :  { %484 = vsyncpa [#allocation4], 1 }

</bundles_post_ra>
